<compile_context>
chip_gen: v7x
topology: tpu7x:2x2x1
jax: 0.10.0
libtpu: 0.0.40
codegen_flags: <defaults>
</compile_context>

<pallas_src>
import jax
import jax.numpy as jnp
from jax.experimental import pallas as pl
from jax.experimental.pallas import tpu as pltpu


_MAX_LANE_TILE = 16 * 1024      # lane-axis block cap (multiple of 128)
_MAX_BLOCK_ELEMS = 1 << 20      # ~4 MiB of f32 per [Bt, Lt] block


def _bbox_transform_kernel(c_ref, m_ref, mq_ref, reg_ref, out_ref):
    """Lane-interleaved pair layout.

      c_ref, m_ref, mq_ref: [1,  Lt]  box-derived per-lane constants (f32)
      reg_ref:              [Bt, Lt]  interleaved (dx, dw)
      out_ref:              [Bt, Lt]  interleaved (xmin, xmax)
    """
    lt = out_ref.shape[-1]
    lane = jax.lax.broadcasted_iota(jnp.int32, (1, lt), 1)
    even = (lane % 2) == 0                                   # [1, Lt]

    rf = reg_ref[...].astype(jnp.float32)                    # [Bt, Lt]
    e = jnp.exp(rf * 0.2)                                    # EUP; only odd lanes used
    g = jnp.where(even, rf, e)                               # even: dx, odd: exp(0.2*dw)
    t = g * m_ref[...]                                       # even: 0.1*dx*w, odd: +0.5*w*exp
    u = g * mq_ref[...]                                      # even: 0.1*dx*w, odd: -0.5*w*exp
    # Signed pair-swap of u: even lane reads its odd partner (i+1), odd lane
    # its even partner (i-1); the roll wrap lanes are never selected.
    pu = jnp.where(even, pltpu.roll(u, lt - 1, 1), pltpu.roll(u, 1, 1))
    out_ref[...] = (c_ref[...] + t + pu).astype(out_ref.dtype)


def _round_up(x, m):
    return ((x + m - 1) // m) * m


def bbox_transform_1d(boxes, reg_preds, *, lane_tile=None, batch_tile=None,
                      out_dtype=None):
    """boxes: [A, 2], reg_preds: [B, A, 2] -> [B, A, 2] (PyTorch BBoxTransform1D).

    out_dtype=None keeps PyTorch's promote-types result dtype; pass e.g.
    reg_preds.dtype to emit a narrower (bf16) result and cut store traffic.
    """
    A, c0 = boxes.shape
    B, A2, c1 = reg_preds.shape
    if c0 != 2 or c1 != 2 or A2 != A:
        raise ValueError("expected boxes [A,2] and reg_preds [B,A,2]")

    L = 2 * A
    if out_dtype is None:
        out_dtype = jnp.promote_types(boxes.dtype, reg_preds.dtype)

    # ---- O(A), batch-independent box precompute (hoisted out of the kernel) ----
    bx = boxes.astype(jnp.float32)
    w = bx[:, 1] - bx[:, 0]
    ctr = bx[:, 0] + 0.5 * w
    c_i = jnp.stack([ctr, ctr], axis=1).reshape(1, L)
    m_i = jnp.stack([0.1 * w, 0.5 * w], axis=1).reshape(1, L)
    mq_i = jnp.stack([0.1 * w, -0.5 * w], axis=1).reshape(1, L)
    reg_i = reg_preds.reshape(B, L)                # free row-major view

    # ---- tile selection (lane tile must keep (dx,dw) pairs intact) ----
    auto_lane = lane_tile is None
    auto_batch = batch_tile is None

    if auto_lane:
        lane_tile = L if L <= _MAX_LANE_TILE else _MAX_LANE_TILE
    else:
        lane_tile = min(int(lane_tile), L)
    if lane_tile != L and lane_tile % 128 != 0:
        raise ValueError(
            "lane_tile must be a multiple of 128 or the full lane extent 2*A; "
            "anything else splits (xmin,xmax)/(dx,dw) pairs across blocks or "
            "violates the (8,128) block constraint")

    if auto_batch:
        if B * lane_tile <= _MAX_BLOCK_ELEMS:
            batch_tile = B
        else:
            bt = max(8, (_MAX_BLOCK_ELEMS // lane_tile) // 8 * 8)
            batch_tile = min(B, bt)
    else:
        batch_tile = min(int(batch_tile), B)
    if batch_tile != B and batch_tile % 8 != 0:
        raise ValueError("batch_tile must be a multiple of 8 or the full batch")

    grid_l = pl.cdiv(L, lane_tile)
    grid_b = pl.cdiv(B, batch_tile)

    # Megacore (v7x has 2 TCs): if the auto-chosen grid is a single tile but
    # the problem is > ~2 MiB, split a parallel axis so both cores get work.
    if grid_l * grid_b == 1 and B * L * 4 > 2 * 1024 * 1024:
        if auto_lane and L >= 256:
            lane_tile = _round_up(pl.cdiv(L, 2), 128)
        elif auto_batch and B >= 16:
            batch_tile = max(8, _round_up(pl.cdiv(B, 2), 8))
        grid_l = pl.cdiv(L, lane_tile)
        grid_b = pl.cdiv(B, batch_tile)

    grid = (grid_l, grid_b)      # lane tiles outer -> [1,L] inputs fetched once per lane tile

    # ---- per-generation VMEM budget ----
    phys_vmem = 64 * 1024 * 1024
    try:
        phys_vmem = int(pltpu.get_tpu_info().vmem_capacity_bytes)
    except Exception:
        pass
    vmem_limit = int(min(64 * 1024 * 1024, (phys_vmem * 3) // 4))  # 64 MiB v5e/v6e, 48 MiB v7x

    bytes_io = (reg_preds.size * reg_preds.dtype.itemsize
                + B * L * jnp.dtype(out_dtype).itemsize
                + 3 * L * 4
                + boxes.size * boxes.dtype.itemsize)
    cost = pl.CostEstimate(flops=9 * B * L, transcendentals=B * L,
                           bytes_accessed=bytes_io)

    small_spec = pl.BlockSpec((1, lane_tile), lambda ia, ib: (0, ia))
    big_spec = pl.BlockSpec((batch_tile, lane_tile), lambda ia, ib: (ib, ia))

    out_i = pl.pallas_call(
        _bbox_transform_kernel,
        out_shape=jax.ShapeDtypeStruct((B, L), out_dtype),
        grid_spec=pltpu.PrefetchScalarGridSpec(
            num_scalar_prefetch=0,
            grid=grid,
            in_specs=[small_spec, small_spec, small_spec, big_spec],
            out_specs=big_spec,
        ),
        compiler_params=pltpu.CompilerParams(
            dimension_semantics=("parallel", "parallel"),
            vmem_limit_bytes=vmem_limit,
        ),
        cost_estimate=cost,
    )(c_i, m_i, mq_i, reg_i)

    return out_i.reshape(B, A, 2)


def _reference(boxes, reg_preds):
    widths = boxes[:, 1] - boxes[:, 0]
    ctr_x = boxes[:, 0] + 0.5 * widths
    dx = reg_preds[:, :, 0] * 0.1
    dw = reg_preds[:, :, 1] * 0.2
    pred_ctr_x = ctr_x + dx * widths
    pred_w = jnp.exp(dw) * widths
    return jnp.stack([pred_ctr_x - 0.5 * pred_w,
                      pred_ctr_x + 0.5 * pred_w], axis=2)


if __name__ == "__main__":
    key = jax.random.PRNGKey(0)
    k_xmin, k_w, k_reg = jax.random.split(key, 3)

    B, A = 2, 128  # batch, number of anchor boxes

    xmin = jax.random.uniform(k_xmin, (A,), jnp.float32, 0.0, 10.0)
    w = jax.random.uniform(k_w, (A,), jnp.float32, 1.0, 5.0)
    boxes = jnp.stack([xmin, xmin + w], axis=1)                    # [A, 2]
    reg_preds = jax.random.normal(k_reg, (B, A, 2), jnp.float32)   # [B, A, 2]

    ref = _reference(boxes, reg_preds)

    out = jax.block_until_ready(bbox_transform_1d(boxes, reg_preds))
    assert out.shape == (B, A, 2)
    assert jnp.allclose(out, ref, atol=1e-5, rtol=1e-5)

    # Exercise the multi-step tiled grid path (lane tiles) on the same data.
    out_tiled = jax.block_until_ready(
        bbox_transform_1d(boxes, reg_preds, lane_tile=128))
    assert jnp.allclose(out_tiled, ref, atol=1e-5, rtol=1e-5)

    # Exercise the narrow-output-dtype option.
    out_bf16 = jax.block_until_ready(
        bbox_transform_1d(boxes, reg_preds, out_dtype=jnp.bfloat16))
    assert jnp.allclose(out_bf16.astype(jnp.float32), ref, atol=5e-2, rtol=5e-2)

    print("KERNEL_OK")
</pallas_src>

<mosaic_0001>
module attributes {stable_mosaic.version = 11 : i64} {
  func.func @_bbox_transform_kernel(%arg0: i32, %arg1: i32, %arg2: memref<1x256xf32, #tpu.memory_space<vmem>>, %arg3: memref<1x256xf32, #tpu.memory_space<vmem>>, %arg4: memref<1x256xf32, #tpu.memory_space<vmem>>, %arg5: memref<2x256xf32, #tpu.memory_space<vmem>>, %arg6: memref<2x256xf32, #tpu.memory_space<vmem>>) attributes {dimension_semantics = [#tpu.dimension_semantics<parallel>, #tpu.dimension_semantics<parallel>], iteration_bounds = array<i64: 1, 1>, scalar_prefetch = 0 : i64, scratch_operands = 0 : i64, tpu.core_type = #tpu.core_type<tc>, window_params = [{transform_indices = @transform_0, window_bounds = array<i64: 1, 256>}, {transform_indices = @transform_1, window_bounds = array<i64: 1, 256>}, {transform_indices = @transform_2, window_bounds = array<i64: 1, 256>}, {transform_indices = @transform_3, window_bounds = array<i64: 2, 256>}, {transform_indices = @transform_4, window_bounds = array<i64: 2, 256>}]} {
    %0 = tpu.iota {dimensions = array<i32: 1>} : vector<1x256xi32>
    %c2_i32 = arith.constant 2 : i32
    %c0_i32 = arith.constant 0 : i32
    %1 = arith.cmpi eq, %c2_i32, %c0_i32 : i32
    %c1_i32 = arith.constant 1 : i32
    %2 = arith.select %1, %c1_i32, %c2_i32 : i32
    %3 = vector.broadcast %2 : i32 to vector<1x256xi32>
    %4 = arith.remsi %0, %3 : vector<1x256xi32>
    %c0_i32_0 = arith.constant 0 : i32
    %5 = vector.broadcast %c0_i32_0 : i32 to vector<1x256xi32>
    %6 = arith.cmpi ne, %4, %5 : vector<1x256xi32>
    %c0_i32_1 = arith.constant 0 : i32
    %7 = vector.broadcast %c0_i32_1 : i32 to vector<1x256xi32>
    %8 = arith.cmpi slt, %4, %7 : vector<1x256xi32>
    %c0_i32_2 = arith.constant 0 : i32
    %9 = arith.cmpi slt, %2, %c0_i32_2 : i32
    %10 = vector.broadcast %9 : i1 to vector<1x256xi1>
    %11 = vector.broadcast %10 : vector<1x256xi1> to vector<1x256xi1>
    %12 = arith.xori %8, %11 : vector<1x256xi1>
    %13 = arith.andi %12, %6 : vector<1x256xi1>
    %14 = vector.broadcast %2 : i32 to vector<1x256xi32>
    %15 = arith.addi %4, %14 : vector<1x256xi32>
    %16 = arith.select %13, %15, %4 : vector<1x256xi1>, vector<1x256xi32>
    %c0_i32_3 = arith.constant 0 : i32
    %17 = vector.broadcast %c0_i32_3 : i32 to vector<1x256xi32>
    %18 = arith.cmpi eq, %16, %17 : vector<1x256xi32>
    %c0 = arith.constant 0 : index
    %c0_4 = arith.constant 0 : index
    %19 = vector.load %arg5[%c0, %c0_4] : memref<2x256xf32, #tpu.memory_space<vmem>>, vector<2x256xf32>
    %cst = arith.constant 2.000000e-01 : f32
    %20 = vector.broadcast %cst : f32 to vector<2x256xf32>
    %21 = arith.mulf %19, %20 : vector<2x256xf32>
    %22 = math.exp %21 : vector<2x256xf32>
    %23 = vector.shape_cast %18 : vector<1x256xi1> to vector<1x256xi1>
    %24 = vector.broadcast %23 : vector<1x256xi1> to vector<2x256xi1>
    %25 = arith.select %24, %19, %22 : vector<2x256xi1>, vector<2x256xf32>
    %c0_5 = arith.constant 0 : index
    %c0_6 = arith.constant 0 : index
    %26 = vector.load %arg3[%c0_5, %c0_6] : memref<1x256xf32, #tpu.memory_space<vmem>>, vector<1x256xf32>
    %27 = vector.broadcast %26 : vector<1x256xf32> to vector<2x256xf32>
    %28 = arith.mulf %25, %27 : vector<2x256xf32>
    %c0_7 = arith.constant 0 : index
    %c0_8 = arith.constant 0 : index
    %29 = vector.load %arg4[%c0_7, %c0_8] : memref<1x256xf32, #tpu.memory_space<vmem>>, vector<1x256xf32>
    %30 = vector.broadcast %29 : vector<1x256xf32> to vector<2x256xf32>
    %31 = arith.mulf %25, %30 : vector<2x256xf32>
    %c255_i32 = arith.constant 255 : i32
    %32 = tpu.dynamic_rotate %31 by %c255_i32 dim 1 : vector<2x256xf32>, i32 -> vector<2x256xf32>
    %c1_i32_9 = arith.constant 1 : i32
    %33 = tpu.dynamic_rotate %31 by %c1_i32_9 dim 1 : vector<2x256xf32>, i32 -> vector<2x256xf32>
    %34 = vector.shape_cast %18 : vector<1x256xi1> to vector<1x256xi1>
    %35 = vector.broadcast %34 : vector<1x256xi1> to vector<2x256xi1>
    %36 = arith.select %35, %32, %33 : vector<2x256xi1>, vector<2x256xf32>
    %c0_10 = arith.constant 0 : index
    %c0_11 = arith.constant 0 : index
    %37 = vector.load %arg2[%c0_10, %c0_11] : memref<1x256xf32, #tpu.memory_space<vmem>>, vector<1x256xf32>
    %38 = vector.broadcast %37 : vector<1x256xf32> to vector<2x256xf32>
    %39 = arith.addf %38, %28 : vector<2x256xf32>
    %40 = arith.addf %39, %36 : vector<2x256xf32>
    %c0_12 = arith.constant 0 : index
    %c0_13 = arith.constant 0 : index
    %41 = vector.load %arg6[%c0_12, %c0_13] : memref<2x256xf32, #tpu.memory_space<vmem>>, vector<2x256xf32>
    tpu.vector_store %arg6[%c0_12, %c0_13], %40 {strides = array<i32>} : memref<2x256xf32, #tpu.memory_space<vmem>>, vector<2x256xf32>,
    return
  }
  func.func @transform_0(%arg0: i32, %arg1: i32) -> (i32, i32) {
    %c0_i32 = arith.constant 0 : i32
    %c0_i32_0 = arith.constant 0 : i32
    return %c0_i32, %arg0 : i32, i32
  }
  func.func @transform_1(%arg0: i32, %arg1: i32) -> (i32, i32) {
    %c0_i32 = arith.constant 0 : i32
    %c0_i32_0 = arith.constant 0 : i32
    return %c0_i32, %arg0 : i32, i32
  }
  func.func @transform_2(%arg0: i32, %arg1: i32) -> (i32, i32) {
    %c0_i32 = arith.constant 0 : i32
    %c0_i32_0 = arith.constant 0 : i32
    return %c0_i32, %arg0 : i32, i32
  }
  func.func @transform_3(%arg0: i32, %arg1: i32) -> (i32, i32) {
    %c0_i32 = arith.constant 0 : i32
    return %arg1, %arg0 : i32, i32
  }
  func.func @transform_4(%arg0: i32, %arg1: i32) -> (i32, i32) {
    %c0_i32 = arith.constant 0 : i32
    return %arg1, %arg0 : i32, i32
  }
}

</mosaic_0001>

<bundles_post_ra>
// kernel: tpu_custom_call.1
= control target key start
LH: loop header
LB: loop body
LE: loop exit
PB: predicated region body
PF: predicated region fallthrough
CT: control target
= control target key end

     0   :  { %9 = vsyncpa [#allocation3], 0  ;;  %s361_s0 = inlined_call_operand.hbm [shape: f32[1,256], index: 0, kind: input, shape index: {}]   ;;  %s362_s1 = inlined_call_operand.vmem [shape: f32[1,256], index: 1, kind: input, shape index: {}]   ;;  %s363_s2 = inlined_call_operand.hbm [shape: f32[1,256], index: 2, kind: input, shape index: {}]   ;;  %s364_s3 = inlined_call_operand.vmem [shape: f32[2,256], index: 3, kind: input, shape index: {}]   ;;  %s365_s4 = inlined_call_operand.hbm [shape: f32[2,256], index: 4, kind: output, shape index: {}]  }
   0x1   :  { %10 = vsyncpa [#allocation6], 0 }
   0x2   :  { %11 = vsyncpa [#allocation4], 0  ;;  %s272_s15 = smov [#allocation2]   ;;  %s273_s17 = smov [#allocation5]  }
   0x3   :  { %s18_s16 = sshll.u32 %s272_s15, 4  ;;  %s30_s18 = sshll.u32 %s273_s17, 4  ;;  %s19_s16 = int_to_ptr.vmem [resolvable:$true] %s18_s16  ;;  %s31_s18 = int_to_ptr.vmem [resolvable:$true] %s30_s18 }
   0x4   :  { %s200_s21 = scalar_lea.hbm %s361_s0, 32 }
   0x5   :  { %p201_p0 = scmp.ne.s32.totalorder %s361_s0, %s200_s21  ;;  %p204_p1 = scmp.lt.u32.totalorder %s200_s21, %s361_s0 }
   0x7   :  { %p206_p2 = pnand %p204_p1, %p201_p0 }
   0x9   :  { %209 = shalt.err (!%p206_p2)
}
   0xa   :  { %s210_s26 = scalar_lea.vmem %s19_s16, 32  ;;  %p215_p4 = scmp.lt.s32.totalorder %s19_s16, %s19_s16 }
   0xb   :  { %p211_p3 = scmp.ne.s32.totalorder %s19_s16, %s210_s26  ;;  %p216_p5 = scmp.lt.s32.totalorder %s210_s26, %s210_s26 }
   0xd   :  { %p217_p6 = por %p216_p5, %p215_p4 }
   0xf   :  { %p218_p7 = pnand %p217_p6, %p211_p3 }
  0x11   :  { %221 = shalt.err (!%p218_p7)
}
  0x12   :  { %21 = dma.hbm_to_vmem [thread:$0]  %s361_s0, 32, %s19_s16, [#allocation3]  }
  0x13   :  { %s222_s5 = scalar_lea.hbm %s363_s2, 32 }
  0x14   :  { %p223_p8 = scmp.ne.s32.totalorder %s363_s2, %s222_s5  ;;  %p226_p9 = scmp.lt.u32.totalorder %s222_s5, %s363_s2 }
  0x16   :  { %p228_p10 = pnand %p226_p9, %p223_p8 }
  0x18   :  { %231 = shalt.err (!%p228_p10)
}
  0x19   :  { %s232_s10 = scalar_lea.vmem %s31_s18, 32  ;;  %p237_p12 = scmp.lt.s32.totalorder %s31_s18, %s31_s18 }
  0x1a   :  { %p233_p11 = scmp.ne.s32.totalorder %s31_s18, %s232_s10  ;;  %p238_p13 = scmp.lt.s32.totalorder %s232_s10, %s232_s10 }
  0x1c   :  { %p239_p0 = por %p238_p13, %p237_p12 }
  0x1e   :  { %p240_p1 = pnand %p239_p0, %p233_p11 }
  0x20   :  { %243 = shalt.err (!%p240_p1)
}
  0x21   :  { %33 = dma.hbm_to_vmem [thread:$0]  %s363_s2, 32, %s31_s18, [#allocation6]  }
  0x22   :  { %266 = dma.done.wait [#allocation3], 32  }
  0x23   :  { %267 = vsyncadd [#allocation3], 4294967264 }
  0x24   :  { %268 = dma.done.wait [#allocation6], 32  }
  0x25   :  { %269 = vsyncadd [#allocation6], 4294967264  ;;  %v71_v0 = vld [vmem:[%s364_s3] sm:$0xf]  ;;  %v42_v2 = vlaneseq  ;;  %v274_v3 = vmov 1983009808  }
  0x26   :  { %v72_v1 = vmul.f32 0.2, %v71_v0  ;;  %v81_v4 = vunpack.c.l.s4 %v274_v3  ;;  %v103_v13 = vld [vmem:[%s362_s1] sm:$0x3]  ;;  %v117_v14 = vld [vmem:[#allocation5] sm:$0x3] }
  0x27   :  { %v84_v7 = vshrl.u32 %v42_v2, 7  ;;  %v43_v8 = vand.u32 127, %v42_v2  ;;  %v147_v18 = vld [vmem:[#allocation2] sm:$0x3]  ;;  %s275_s1 = smov 1   ;;  %s276_s3 = smov 127  }
  0x28   :  { %v73_v5 = vmul.f32 1.442695, %v72_v1  ;;  %v82_v6 = vunpack.c.0.s8 %v81_v4  ;;  %s277_s15 = smov [#allocation7]  }
  0x29   :  { %v44_v9 = vadd.s32 128, %v43_v8  ;;  %v49_v11 = vand.u32 1, %v43_v8  ;;  %v107_v12 = vsub.s32 0, %v84_v7  ;;  %v111_v15 = vsub.s32 1, %v84_v7  ;;  %s181_s16 = sshll.u32 %s277_s15, 4  ;;  %s182_s16 = int_to_ptr.vmem [resolvable:$true] %s181_s16 }
  0x2a   :  { %198 = vpow2.f32 %v73_v5  ;;  %v85_v10 = vsub.s32 %v82_v6, %v84_v7  ;;  %vm142_vm2 = vcmp.lt.s32.totalorder %v43_v8, 1  ;;  %vm135_vm3 = vcmp.lt.s32.totalorder %v43_v8, 127  ;;  %s244_s17 = scalar_lea.vmem %s182_s16, 64  ;;  %p249_p3 = scmp.lt.s32.totalorder %s182_s16, %s182_s16 }
  0x2b   :  { %v56_v16 = vand.u32 1, %v44_v9  ;;  %vm333_vm0 = vcmp.eq.s32.totalorder %v49_v11, 0  ;;  %v108_v21 = vrot.slane %v103_v13, %v107_v12  ;;  %v122_v22 = vrot.slane %v117_v14, %v107_v12  ;;  %p245_p2 = scmp.ne.s32.totalorder %s182_s16, %s244_s17  ;;  %p250_p4 = scmp.lt.s32.totalorder %s244_s17, %s244_s17 }
  0x2c   :  { %v86_v17 = vrot.slane %v71_v0, %v85_v10  ;;  %v112_v25 = vrot.slane %v103_v13, %v111_v15  ;;  %v126_v26 = vrot.slane %v117_v14, %v111_v15  ;;  %v152_v27 = vrot.slane %v147_v18, %v107_v12 }
  0x2d   :  { %vm337_vm1 = vcmp.eq.s32.totalorder %v56_v16, 0  ;;  %v156_v33 = vrot.slane %v147_v18, %v111_v15  ;;  %p251_p5 = por %p250_p4, %p249_p3 }
  0x2e   :  { %v87_v23 = vcombine.high %v86_v17, %v86_v17 }
  0x2f   :  { %p252_p6 = pnand %p251_p5, %p245_p2 }
  0x34   :  { %v199_v19 = vpop.eup %198 }
  0x35   :  { %v97_v24 = vrot.slane %v199_v19, %v85_v10 }
  0x37   :  { %v101_v29 = vsel %vm333_vm0, %v86_v17, %v97_v24  ;;  %v98_v30 = vcombine.high %v97_v24, %v97_v24 }
  0x38   :  { %v129_v31 = vmul.f32 %v122_v22, %v101_v29  ;;  %v115_v32 = vmul.f32 %v108_v21, %v101_v29 }
  0x39   :  { %v102_v34 = vsel %vm337_vm1, %v87_v23, %v98_v30 }
  0x3a   :  { %138 = vrot.lane.b32.xlu1 %v129_v31, %s275_s1  ;;  %v159_v35 = vadd.f32 %v152_v27, %v115_v32  ;;  %131 = vrot.lane.b32.xlu0 %v129_v31, %s276_s3  ;;  %v130_v36 = vmul.f32 %v126_v26, %v102_v34  ;;  %v116_v37 = vmul.f32 %v112_v25, %v102_v34 }
  0x3c   :  { %v160_v38 = vadd.f32 %v156_v33, %v116_v37 }
  0x3e   :  { %140 = vrot.lane.b32.xlu1 %v130_v36, %s275_s1  ;;  %133 = vrot.lane.b32.xlu0 %v130_v36, %s276_s3 }
  0xac   :  { %v139_v39 = vpop.permute.xlu1 %138  ;;  %v132_v40 = vpop.permute.xlu0 %131 }
  0xb0   :  { %v141_v41 = vpop.permute.xlu1 %140  ;;  %v134_v42 = vpop.permute.xlu0 %133 }
  0xb1   :  { %v143_v43 = vsel %vm142_vm2, %v139_v39, %v141_v41  ;;  %v144_v44 = vsel %vm142_vm2, %v141_v41, %v139_v39  ;;  %v136_v45 = vsel %vm135_vm3, %v132_v40, %v134_v42  ;;  %v137_v46 = vsel %vm135_vm3, %v134_v42, %v132_v40 }
  0xb2   :  { %v145_v47 = vsel %vm333_vm0, %v136_v45, %v144_v44  ;;  %v146_v48 = vsel %vm337_vm1, %v137_v46, %v143_v43 }
  0xb3   :  { %v161_v49 = vadd.f32 %v159_v35, %v145_v47  ;;  %v162_v50 = vadd.f32 %v160_v38, %v146_v48 }
  0xb5   :  { %v165_v51 = vcombine.low %v161_v49, %v162_v50 }
  0xb7   :  { %191 = vst.sshfl [vmem:[#allocation7] sm:$0x33 pattern:$0x76325410] %v165_v51 }
  0xb8   :  { %255 = shalt.err (!%p252_p6)
}
  0xb9   :  { %s256_s20 = scalar_lea.hbm %s365_s4, 64 }
  0xba   :  { %p257_p7 = scmp.ne.s32.totalorder %s365_s4, %s256_s20  ;;  %p260_p8 = scmp.lt.u32.totalorder %s256_s20, %s365_s4 }
  0xbc   :  { %p262_p9 = pnand %p260_p8, %p257_p7 }
  0xbe   :  { %265 = shalt.err (!%p262_p9)
}
  0xbf   :  { %184 = dma.vmem_to_hbm [thread:$0]  %s182_s16, 64, %s365_s4, [#allocation4]  }
  0xc0   :  { %270 = dma.done.wait [#allocation4], 64  }
  0xc1   :  { %271 = vsyncadd [#allocation4], 4294967232 }
  0xc2   :  { %188 = vsyncpa [#allocation3], 1 }
  0xc3   :  { %189 = vsyncpa [#allocation6], 1 }
  0xc4   :  { %190 = vsyncpa [#allocation4], 1 }

</bundles_post_ra>
